<compile_context>
chip_gen: v5e
topology: v5e:2x2
jax: 0.10.0
libtpu: 0.0.40
codegen_flags: <defaults>
</compile_context>

<pallas_src>
import functools

import jax
import jax.numpy as jnp
import numpy as np
from jax.experimental import pallas as pl
from jax.experimental.pallas import tpu as pltpu

NEG_SLOPE = 0.2
MASK_VALUE = -1e30


# ---------------------------------------------------------------------------
# Kernel 1: fused projection  proj = x @ [W_all | W_el | W_er]
# ---------------------------------------------------------------------------
def gat_project_kernel(x_ref, w_ref, feat_ref, el_ref, er_ref, *, num_heads, out_feats):
    hd = num_heads * out_feats
    proj = jnp.dot(x_ref[...], w_ref[...], preferred_element_type=jnp.float32)
    feat_ref[...] = proj[:, :hd]                     # (Tn, H*D)
    el_ref[...] = proj[:, hd:hd + num_heads]         # (Tn, H)
    er_ref[...] = proj[:, hd + num_heads:]           # (Tn, H)


# ---------------------------------------------------------------------------
# Kernel 2: flash-style edge softmax + aggregation over src tiles.
# ---------------------------------------------------------------------------
def gat_attention_kernel(feat_ref, el_ref, er_ref, adj_ref, bias_ref, out_ref,
                         m_ref, l_ref, acc_ref, *, num_heads, out_feats):
    d = out_feats
    ki = pl.program_id(1)

    @pl.when(ki == 0)
    def _init():
        m_ref[...] = jnp.full_like(m_ref, MASK_VALUE)
        l_ref[...] = jnp.zeros_like(l_ref)
        acc_ref[...] = jnp.zeros_like(acc_ref)

    mask = adj_ref[...] > 0                    # (Tq, Tk) bool (int8 in HBM)
    el = el_ref[...]                           # (H, Tk)  src logits, already row layout
    er = er_ref[...]                           # (Tq, H)  dst logits, already column layout
    feat = feat_ref[...]                       # (Tk, H*D) src features

    for h in range(num_heads):                 # static unroll over heads
        # e[i, j] = leaky_relu(el[j] + er[i]) for edge j -> i   (no transposes)
        e = er[:, h:h + 1] + el[h:h + 1, :]                          # (Tq, Tk)
        e = jnp.where(e > 0, e, NEG_SLOPE * e)
        e = jnp.where(mask, e, MASK_VALUE)

        m_old = m_ref[:, h:h + 1]                                    # (Tq, 1)
        m_new = jnp.maximum(m_old, jnp.max(e, axis=-1, keepdims=True))
        # exponentiate MASKED logits (argument <= 0 -> no overflow); the where()
        # also kills the exp(0)=1 artifact on rows with no edges in this tile.
        p = jnp.where(mask, jnp.exp(e - m_new), 0.0)                 # (Tq, Tk)
        alpha = jnp.exp(m_old - m_new)                               # (Tq, 1)

        m_ref[:, h:h + 1] = m_new
        l_ref[:, h:h + 1] = alpha * l_ref[:, h:h + 1] + jnp.sum(p, axis=-1, keepdims=True)
        f_h = feat[:, h * d:(h + 1) * d]                             # (Tk, D)
        acc_ref[h] = alpha * acc_ref[h] + jnp.dot(p, f_h, preferred_element_type=jnp.float32)

    @pl.when(ki == pl.num_programs(1) - 1)
    def _finalize():
        bias = bias_ref[...]                                         # (1, H*D)
        l = l_ref[...]                                               # (Tq, H)
        denom = jnp.where(l > 0.0, l, 1.0)                           # zero in-degree guard
        inv = pl.reciprocal(denom, approx=True)                      # EUP approx
        inv = inv * (2.0 - denom * inv)                              # one Newton step -> f32 accuracy
        for h in range(num_heads):
            out_ref[:, h * d:(h + 1) * d] = (
                acc_ref[h] * inv[:, h:h + 1] + bias[:, h * d:(h + 1) * d])


# ---------------------------------------------------------------------------
# Wrapper
# ---------------------------------------------------------------------------
def gat_conv_pallas(x, fc_weight, attn_l, attn_r, adj, bias, num_heads, out_feats,
                    *, tile_n=128, tile_q=128, tile_k=128):
    """
    x:         (N, D_in) float32
    fc_weight: (H*D, D_in)  -- PyTorch nn.Linear convention
    attn_l/r:  (1, H, D)
    adj:       (N, N), adj[i, j] != 0 iff edge j -> i (any numeric dtype; used as mask)
    bias:      (H*D,)
    returns:   (N, H, D) float32
    """
    N, d_in = x.shape
    H, D = num_heads, out_feats
    HD = H * D

    tile_n = min(tile_n, N)
    tile_q = min(tile_q, N)
    tile_k = min(tile_k, N)
    assert N % tile_n == 0 and N % tile_q == 0 and N % tile_k == 0, \
        "N must be a multiple of the tile sizes"

    # Fold attn_l / attn_r into the projection weight:
    #   el_h = feat_h . attn_l_h = x . (W_h @ attn_l_h)   (extra matmul columns)
    w_all = fc_weight.T.astype(jnp.float32)                          # (D_in, H*D)
    w_heads = w_all.reshape(d_in, H, D)
    w_el = jnp.einsum('khd,hd->kh', w_heads, attn_l.reshape(H, D).astype(jnp.float32))
    w_er = jnp.einsum('khd,hd->kh', w_heads, attn_r.reshape(H, D).astype(jnp.float32))
    w_ext = jnp.concatenate([w_all, w_el, w_er], axis=-1)            # (D_in, H*D + 2H)
    P = HD + 2 * H

    feat, el_nh, er_nh = pl.pallas_call(
        functools.partial(gat_project_kernel, num_heads=H, out_feats=D),
        out_shape=(jax.ShapeDtypeStruct((N, HD), jnp.float32),
                   jax.ShapeDtypeStruct((N, H), jnp.float32),
                   jax.ShapeDtypeStruct((N, H), jnp.float32)),
        grid_spec=pltpu.PrefetchScalarGridSpec(
            num_scalar_prefetch=0,
            grid=(N // tile_n,),
            in_specs=[pl.BlockSpec((tile_n, d_in), lambda i: (i, 0)),
                      pl.BlockSpec((d_in, P), lambda i: (0, 0))],
            out_specs=(pl.BlockSpec((tile_n, HD), lambda i: (i, 0)),
                       pl.BlockSpec((tile_n, H), lambda i: (i, 0)),
                       pl.BlockSpec((tile_n, H), lambda i: (i, 0)))),
        compiler_params=pltpu.CompilerParams(dimension_semantics=("parallel",)),
    )(x.astype(jnp.float32), w_ext)

    el_hn = el_nh.T                               # (H, N): row layout for src side (one-time)
    adj_i8 = adj.astype(jnp.int8)                 # mask only -> 4x less HBM->VMEM DMA than f32
    bias_row = bias.reshape(1, HD).astype(jnp.float32)

    out = pl.pallas_call(
        functools.partial(gat_attention_kernel, num_heads=H, out_feats=D),
        out_shape=jax.ShapeDtypeStruct((N, HD), jnp.float32),
        grid_spec=pltpu.PrefetchScalarGridSpec(
            num_scalar_prefetch=0,
            grid=(N // tile_q, N // tile_k),      # src reduction axis last
            in_specs=[
                pl.BlockSpec((tile_k, HD), lambda qi, ki: (ki, 0)),       # feat (src tile)
                pl.BlockSpec((H, tile_k), lambda qi, ki: (0, ki)),        # el   (src tile)
                pl.BlockSpec((tile_q, H), lambda qi, ki: (qi, 0)),        # er   (dst tile)
                pl.BlockSpec((tile_q, tile_k), lambda qi, ki: (qi, ki)),  # adjacency tile (int8)
                pl.BlockSpec((1, HD), lambda qi, ki: (0, 0)),             # bias
            ],
            out_specs=pl.BlockSpec((tile_q, HD), lambda qi, ki: (qi, 0)), # lane-dense (N, H*D)
            scratch_shapes=[pltpu.VMEM((tile_q, H), jnp.float32),         # running max m
                            pltpu.VMEM((tile_q, H), jnp.float32),         # running denom l
                            pltpu.VMEM((H, tile_q, D), jnp.float32)]),    # accumulator
        compiler_params=pltpu.CompilerParams(
            dimension_semantics=("parallel", "arbitrary"),
            vmem_limit_bytes=32 * 1024 * 1024),
    )(feat, el_hn, er_nh, adj_i8, bias_row)

    return out.reshape(N, H, D)                   # pure reshape, no transpose


# ---------------------------------------------------------------------------
# Pure-JAX reference mirroring DGL GATConv semantics (dense adjacency).
# ---------------------------------------------------------------------------
def gat_conv_reference(x, fc_weight, attn_l, attn_r, adj, bias, num_heads, out_feats):
    N = x.shape[0]
    H, D = num_heads, out_feats
    feat = (x @ fc_weight.T).reshape(N, H, D)
    el = (feat * attn_l).sum(-1)                                     # (N, H)
    er = (feat * attn_r).sum(-1)                                     # (N, H)
    e = er[:, None, :] + el[None, :, :]                              # (N_dst, N_src, H)
    e = jnp.where(e > 0, e, NEG_SLOPE * e)
    mask = (adj > 0)[:, :, None]
    e_m = jnp.where(mask, e, MASK_VALUE)
    m = e_m.max(axis=1, keepdims=True)
    p = jnp.where(mask, jnp.exp(e_m - m), 0.0)
    a = p / p.sum(axis=1, keepdims=True)
    rst = jnp.einsum('ijh,jhd->ihd', a, feat)
    return rst + bias.reshape(1, H, D)


if __name__ == "__main__":
    # Small but tiling-exercising problem: 256 nodes -> 2x2 (dst, src) tile grid.
    N, D_IN, H, D_OUT = 256, 32, 4, 16

    key = jax.random.PRNGKey(0)
    k_x, k_w, k_al, k_ar, k_adj = jax.random.split(key, 5)

    x = jax.random.normal(k_x, (N, D_IN), dtype=jnp.float32)

    # Deterministic xavier_normal-style init, gain = sqrt(2) ('relu').
    gain = float(np.sqrt(2.0))
    std_fc = gain * float(np.sqrt(2.0 / (D_IN + H * D_OUT)))
    fc_weight = std_fc * jax.random.normal(k_w, (H * D_OUT, D_IN), dtype=jnp.float32)
    std_attn = gain * float(np.sqrt(2.0 / (H + D_OUT)))
    attn_l = std_attn * jax.random.normal(k_al, (1, H, D_OUT), dtype=jnp.float32)
    attn_r = std_attn * jax.random.normal(k_ar, (1, H, D_OUT), dtype=jnp.float32)
    bias = jnp.zeros((H * D_OUT,), dtype=jnp.float32)   # reset_parameters() -> 0

    # Random sparse graph with self-loops (no zero-in-degree nodes), int8 mask.
    adj = ((jax.random.uniform(k_adj, (N, N)) < 0.1)
           | jnp.eye(N, dtype=bool)).astype(jnp.int8)

    out = gat_conv_pallas(x, fc_weight, attn_l, attn_r, adj, bias, H, D_OUT)
    out = jax.block_until_ready(out)

    ref = gat_conv_reference(x, fc_weight, attn_l, attn_r, adj, bias, H, D_OUT)
    np.testing.assert_allclose(np.asarray(out), np.asarray(ref), rtol=1e-4, atol=1e-4)

    print("KERNEL_OK")
</pallas_src>

<mosaic_0001>
module attributes {stable_mosaic.version = 11 : i64} {
  func.func @gat_project_kernel(%arg0: i32, %arg1: memref<128x32xf32, #tpu.memory_space<vmem>>, %arg2: memref<32x72xf32, #tpu.memory_space<vmem>>, %arg3: memref<128x64xf32, #tpu.memory_space<vmem>>, %arg4: memref<128x4xf32, #tpu.memory_space<vmem>>, %arg5: memref<128x4xf32, #tpu.memory_space<vmem>>) attributes {dimension_semantics = [#tpu.dimension_semantics<parallel>], iteration_bounds = array<i64: 2>, scalar_prefetch = 0 : i64, scratch_operands = 0 : i64, tpu.core_type = #tpu.core_type<tc>, window_params = [{transform_indices = @transform_0, window_bounds = array<i64: 128, 32>}, {pipeline_mode = #tpu.pipeline_mode<synchronous>, transform_indices = @transform_1, window_bounds = array<i64: 32, 72>}, {transform_indices = @transform_2, window_bounds = array<i64: 128, 64>}, {transform_indices = @transform_3, window_bounds = array<i64: 128, 4>}, {transform_indices = @transform_4, window_bounds = array<i64: 128, 4>}]} {
    %c0 = arith.constant 0 : index
    %c0_0 = arith.constant 0 : index
    %0 = vector.load %arg1[%c0, %c0_0] : memref<128x32xf32, #tpu.memory_space<vmem>>, vector<128x32xf32>
    %c0_1 = arith.constant 0 : index
    %c0_2 = arith.constant 0 : index
    %1 = vector.load %arg2[%c0_1, %c0_2] : memref<32x72xf32, #tpu.memory_space<vmem>>, vector<32x72xf32>
    %cst = arith.constant dense<0.000000e+00> : vector<128x72xf32>
    %2 = tpu.matmul %0, %1, %cst {dimension_numbers = #tpu.dot_dimension_numbers<[1], [0], [0], [1], [0, 0, 1, 1], [], []>} : vector<128x32xf32>, vector<32x72xf32>, vector<128x72xf32> -> vector<128x72xf32>
    %3 = vector.extract_strided_slice %2 {offsets = [0, 0], sizes = [128, 64], strides = [1, 1]} : vector<128x72xf32> to vector<128x64xf32>
    %c0_3 = arith.constant 0 : index
    %c0_4 = arith.constant 0 : index
    %4 = vector.load %arg3[%c0_3, %c0_4] : memref<128x64xf32, #tpu.memory_space<vmem>>, vector<128x64xf32>
    tpu.vector_store %arg3[%c0_3, %c0_4], %3 {strides = array<i32>} : memref<128x64xf32, #tpu.memory_space<vmem>>, vector<128x64xf32>,
    %5 = vector.extract_strided_slice %2 {offsets = [0, 64], sizes = [128, 4], strides = [1, 1]} : vector<128x72xf32> to vector<128x4xf32>
    %c0_5 = arith.constant 0 : index
    %c0_6 = arith.constant 0 : index
    %6 = vector.load %arg4[%c0_5, %c0_6] : memref<128x4xf32, #tpu.memory_space<vmem>>, vector<128x4xf32>
    tpu.vector_store %arg4[%c0_5, %c0_6], %5 {strides = array<i32>} : memref<128x4xf32, #tpu.memory_space<vmem>>, vector<128x4xf32>,
    %7 = vector.extract_strided_slice %2 {offsets = [0, 68], sizes = [128, 4], strides = [1, 1]} : vector<128x72xf32> to vector<128x4xf32>
    %c0_7 = arith.constant 0 : index
    %c0_8 = arith.constant 0 : index
    %8 = vector.load %arg5[%c0_7, %c0_8] : memref<128x4xf32, #tpu.memory_space<vmem>>, vector<128x4xf32>
    tpu.vector_store %arg5[%c0_7, %c0_8], %7 {strides = array<i32>} : memref<128x4xf32, #tpu.memory_space<vmem>>, vector<128x4xf32>,
    return
  }
  func.func @transform_0(%arg0: i32) -> (i32, i32) {
    %c0_i32 = arith.constant 0 : i32
    %c0_i32_0 = arith.constant 0 : i32
    return %arg0, %c0_i32 : i32, i32
  }
  func.func @transform_1(%arg0: i32) -> (i32, i32) {
    %c0_i32 = arith.constant 0 : i32
    %c0_i32_0 = arith.constant 0 : i32
    %c0_i32_1 = arith.constant 0 : i32
    return %c0_i32, %c0_i32_0 : i32, i32
  }
  func.func @transform_2(%arg0: i32) -> (i32, i32) {
    %c0_i32 = arith.constant 0 : i32
    %c0_i32_0 = arith.constant 0 : i32
    return %arg0, %c0_i32 : i32, i32
  }
  func.func @transform_3(%arg0: i32) -> (i32, i32) {
    %c0_i32 = arith.constant 0 : i32
    %c0_i32_0 = arith.constant 0 : i32
    return %arg0, %c0_i32 : i32, i32
  }
  func.func @transform_4(%arg0: i32) -> (i32, i32) {
    %c0_i32 = arith.constant 0 : i32
    %c0_i32_0 = arith.constant 0 : i32
    return %arg0, %c0_i32 : i32, i32
  }
}

</mosaic_0001>

<bundles_post_ra>
// kernel: tpu_custom_call.1
= control target key start
LH: loop header
LB: loop body
LE: loop exit
PB: predicated region body
PF: predicated region fallthrough
CT: control target
= control target key end

     0   :  { %s736_s15 = smov 0   ;;  %s945_s0 = inlined_call_operand.vmem [shape: f32[256,32], index: 0, kind: input, shape index: {}]   ;;  %s946_s1 = inlined_call_operand.vmem [shape: f32[32,72], index: 1, kind: input, shape index: {}]   ;;  %s947_s2 = inlined_call_operand.vmem [shape: f32[256,64], index: 2, kind: output, shape index: {0}]   ;;  %s948_s3 = inlined_call_operand.vmem [shape: f32[256,4], index: 3, kind: output, shape index: {1}]   ;;  %s949_s4 = inlined_call_operand.vmem [shape: f32[256,4], index: 4, kind: output, shape index: {2}]  }
   0x1 LB: > { %s648_s16 = sadd.s32 4294967295, %s707_s15   ;;  %p652_p0 = scmp.ge.s32.totalorder %s707_s15, 1  ;;  %s707_s15 = sphi %s736_s15, %s15_s15  }
   0x2   : > { %p168_p1 = scmp.lt.s32.totalorder %s707_s15, 3 }
   0x4   : > { %p169_p2 = pnand %p652_p0, %p168_p1 }
   0x5   : > { %s653_s21 = sshll.u32 (!%p169_p2), %s648_s16, 4  ;;  %s709_s7 = smov (!%p169_p2), 64  }
   0x6   : > { %172 = sbr.rel (%p169_p2) target bundleno = 342 (0x156), region = 28  ;;  %p205_p3 = scmp.lt.s32.totalorder (!%p169_p2), %s653_s21, 31 }
   0x7   : > { %s710_s8 = smov (!%p169_p2), 60  }
   0xb   : > { %v247_v0 = vld [vmem:[%s946_s1 + $0x18] sm:$0xff]  ;;  %v246_v1 = vld [vmem:[%s946_s1 + $0x10] sm:$0xff]  ;;  %v245_v2 = vld [vmem:[%s946_s1 + $0x8] sm:$0xff]  ;;  %s951_s21 = smov (!%p205_p3, %s653_s21), 31  ;;  %vm248_vm0 = vcmask 261120   ;;  %vm362_vm1 = vcmask 523264  }
   0xc   : > { %309 = vmatpush.msra.mxu0 %v247_v0  ;;  %679 = vmatpush.msra.mxu1 %v247_v0  ;;  %v244_v3 = vld [vmem:[%s946_s1] sm:$0xff]  ;;  %s756_s26 = sshll.u32 %s951_s21, 3  ;;  %vm443_vm2 = vcmask 31744  }
   0xd   : > { %681 = vmatpush.msra.mxu3 %v247_v0  ;;  %680 = vmatpush.msra.mxu2 %v247_v0  ;;  %s762_s29 = scalar_lea.vmem %s945_s0, %s756_s26  ;;  %s800_s6 = scalar_lea.vmem %s947_s2, %s756_s26 }
   0xe   : > { %310 = vmatpush.msra.mxu0 %v246_v1  ;;  %682 = vmatpush.msra.mxu1 %v246_v1  ;;  %v228_v4 = vld [vmem:[%s762_s29] sm:$0xff]  ;;  %v229_v8 = vld [vmem:[%s762_s29 + $0x8] sm:$0xff]  ;;  %v230_v12 = vld [vmem:[%s762_s29 + $0x10] sm:$0xff]  ;;  %s870_s11 = scalar_lea.vmem %s948_s3, %s756_s26  ;;  %s878_s14 = scalar_lea.vmem %s949_s4, %s756_s26 }
   0xf   : > { %684 = vmatpush.msra.mxu3 %v246_v1  ;;  %683 = vmatpush.msra.mxu2 %v246_v1  ;;  %v232_v5 = vld [vmem:[%s762_s29 + $0x20] sm:$0xff]  ;;  %v233_v9 = vld [vmem:[%s762_s29 + $0x28] sm:$0xff]  ;;  %v234_v13 = vld [vmem:[%s762_s29 + $0x30] sm:$0xff] }
  0x10   : > { %311 = vmatpush.msra.mxu0 %v245_v2  ;;  %685 = vmatpush.msra.mxu1 %v245_v2  ;;  %v240_v6 = vld [vmem:[%s762_s29 + $0x60] sm:$0xff]  ;;  %v241_v10 = vld [vmem:[%s762_s29 + $0x68] sm:$0xff]  ;;  %v242_v14 = vld [vmem:[%s762_s29 + $0x70] sm:$0xff] }
  0x11   : > { %687 = vmatpush.msra.mxu3 %v245_v2  ;;  %686 = vmatpush.msra.mxu2 %v245_v2  ;;  %v236_v7 = vld [vmem:[%s762_s29 + $0x40] sm:$0xff]  ;;  %v237_v11 = vld [vmem:[%s762_s29 + $0x48] sm:$0xff]  ;;  %v238_v15 = vld [vmem:[%s762_s29 + $0x50] sm:$0xff] }
  0x12   : > { %312 = vmatpush.msra.mxu0 %v244_v3  ;;  %688 = vmatpush.msra.mxu1 %v244_v3  ;;  %v231_v16 = vld [vmem:[%s762_s29 + $0x18] sm:$0xff] }
  0x13   : > { %661 = vmatmul.msk.f32.vlgmr.msra.gmra.mxu0 %vm248_vm0, %v228_v4  ;;  %665 = vmatmul.msk.f32.vlgmr.msra.gmra.mxu1 %vm248_vm0, %v232_v5  ;;  %v235_v17 = vld [vmem:[%s762_s29 + $0x38] sm:$0xff] }
  0x14   : > { %690 = vmatpush.msra.mxu3 %v244_v3  ;;  %689 = vmatpush.msra.mxu2 %v244_v3  ;;  %v239_v18 = vld [vmem:[%s762_s29 + $0x58] sm:$0xff] }
  0x15   : > { %673 = vmatmul.msk.f32.vlgmr.msra.gmra.mxu3 %vm248_vm0, %v240_v6  ;;  %669 = vmatmul.msk.f32.vlgmr.msra.gmra.mxu2 %vm248_vm0, %v236_v7  ;;  %v243_v19 = vld [vmem:[%s762_s29 + $0x78] sm:$0xff] }
  0x1b   : > { %662 = vmatmul.msk.f32.gmra.mxu0 %vm248_vm0, %v229_v8  ;;  %666 = vmatmul.msk.f32.gmra.mxu1 %vm248_vm0, %v233_v9 }
  0x1d   : > { %674 = vmatmul.msk.f32.gmra.mxu3 %vm248_vm0, %v241_v10  ;;  %670 = vmatmul.msk.f32.gmra.mxu2 %vm248_vm0, %v237_v11 }
  0x23   : > { %663 = vmatmul.msk.f32.gmra.mxu0 %vm248_vm0, %v230_v12  ;;  %667 = vmatmul.msk.f32.gmra.mxu1 %vm248_vm0, %v234_v13 }
  0x25   : > { %675 = vmatmul.msk.f32.gmra.mxu3 %vm248_vm0, %v242_v14  ;;  %671 = vmatmul.msk.f32.gmra.mxu2 %vm248_vm0, %v238_v15 }
  0x2b   : > { %664 = vmatmul.msk.f32.gmra.mxu0 %vm248_vm0, %v231_v16  ;;  %668 = vmatmul.msk.f32.gmra.mxu1 %vm248_vm0, %v235_v17 }
  0x2d   : > { %672 = vmatmul.msk.f32.gmra.mxu2 %vm248_vm0, %v239_v18  ;;  %676 = vmatmul.msk.f32.gmra.mxu3 %vm248_vm0, %v243_v19 }
  0x90   : > { %v314_v20 = vpop.f32.mrf.mxu0  ;;  %v326_v21 = vpop.f32.mrf.mxu1 }
  0x91   : > { %363 = vst.msk [vmem:[%s800_s6] sm:$0xff] %vm362_vm1, %v314_v20  ;;  %403 = vrot.lane.b32.xlu2 %v326_v21, %s709_s7  ;;  %460 = vrot.lane.b32.xlu1 %v314_v20, %s710_s8 }
  0x92   : > { %367 = vst.msk [vmem:[%s800_s6 + $0x20] sm:$0xff] %vm362_vm1, %v326_v21  ;;  %395 = vrot.lane.b32.xlu0 %v314_v20, %s709_s7 }
  0x98   : > { %v350_v22 = vpop.f32.mrf.mxu3  ;;  %v338_v23 = vpop.f32.mrf.mxu2 }
  0x99   : > { %375 = vst.msk [vmem:[%s800_s6 + $0x60] sm:$0xff] %vm362_vm1, %v350_v22  ;;  %468 = vrot.lane.b32.xlu2 %v326_v21, %s710_s8  ;;  %484 = vrot.lane.b32.xlu1 %v350_v22, %s710_s8  ;;  %v317_v24 = vpop.f32.mrf.mxu0  ;;  %v329_v25 = vpop.f32.mrf.mxu1 }
  0x9a   : > { %419 = vrot.lane.b32.xlu0 %v350_v22, %s709_s7  ;;  %371 = vst.msk [vmem:[%s800_s6 + $0x40] sm:$0xff] %vm362_vm1, %v338_v23 }
  0x9b   : > { %364 = vst.msk [vmem:[%s800_s6 + $0x8] sm:$0xff] %vm362_vm1, %v317_v24 }
  0x9c   : > { %368 = vst.msk [vmem:[%s800_s6 + $0x28] sm:$0xff] %vm362_vm1, %v329_v25 }
  0xa0   : > { %v353_v26 = vpop.f32.mrf.mxu3  ;;  %v341_v27 = vpop.f32.mrf.mxu2 }
  0xa1   : > { %376 = vst.msk [vmem:[%s800_s6 + $0x68] sm:$0xff] %vm362_vm1, %v353_v26  ;;  %411 = vrot.lane.b32.xlu2 %v338_v23, %s709_s7  ;;  %421 = vrot.lane.b32.xlu1 %v353_v26, %s709_s7  ;;  %v320_v28 = vpop.f32.mrf.mxu0  ;;  %v332_v29 = vpop.f32.mrf.mxu1 }
  0xa2   : > { %476 = vrot.lane.b32.xlu0 %v338_v23, %s710_s8  ;;  %372 = vst.msk [vmem:[%s800_s6 + $0x48] sm:$0xff] %vm362_vm1, %v341_v27 }
  0xa3   : > { %365 = vst.msk [vmem:[%s800_s6 + $0x10] sm:$0xff] %vm362_vm1, %v320_v28 }
  0xa4   : > { %369 = vst.msk [vmem:[%s800_s6 + $0x30] sm:$0xff] %vm362_vm1, %v332_v29 }
  0xa8   : > { %v356_v30 = vpop.f32.mrf.mxu3  ;;  %v344_v31 = vpop.f32.mrf.mxu2 }
  0xa9   : > { %405 = vrot.lane.b32.xlu2 %v329_v25, %s709_s7  ;;  %478 = vrot.lane.b32.xlu1 %v341_v27, %s710_s8  ;;  %377 = vst.msk [vmem:[%s800_s6 + $0x70] sm:$0xff] %vm362_vm1, %v356_v30  ;;  %v323_v32 = vpop.f32.mrf.mxu0  ;;  %v335_v33 = vpop.f32.mrf.mxu1 }
  0xaa   : > { %397 = vrot.lane.b32.xlu0 %v317_v24, %s709_s7  ;;  %373 = vst.msk [vmem:[%s800_s6 + $0x50] sm:$0xff] %vm362_vm1, %v344_v31 }
  0xab   : > { %366 = vst.msk [vmem:[%s800_s6 + $0x18] sm:$0xff] %vm362_vm1, %v323_v32 }
  0xac   : > { %370 = vst.msk [vmem:[%s800_s6 + $0x38] sm:$0xff] %vm362_vm1, %v335_v33 }
  0xb0   : > { %v347_v34 = vpop.f32.mrf.mxu2  ;;  %v359_v35 = vpop.f32.mrf.mxu3 }
  0xb1   : > { %462 = vrot.lane.b32.xlu2 %v317_v24, %s710_s8  ;;  %399 = vrot.lane.b32.xlu1 %v320_v28, %s709_s7  ;;  %374 = vst.msk [vmem:[%s800_s6 + $0x58] sm:$0xff] %vm362_vm1, %v347_v34 }
  0xb2   : > { %470 = vrot.lane.b32.xlu0 %v329_v25, %s710_s8  ;;  %378 = vst.msk [vmem:[%s800_s6 + $0x78] sm:$0xff] %vm362_vm1, %v359_v35 }
  0xb9   : > { %423 = vrot.lane.b32.xlu2 %v356_v30, %s709_s7  ;;  %472 = vrot.lane.b32.xlu1 %v332_v29, %s710_s8 }
  0xba   : > { %413 = vrot.lane.b32.xlu0 %v341_v27, %s709_s7 }
  0xc1   : > { %480 = vrot.lane.b32.xlu2 %v344_v31, %s710_s8  ;;  %415 = vrot.lane.b32.xlu1 %v344_v31, %s709_s7 }
  0xc2   : > { %407 = vrot.lane.b32.xlu0 %v332_v29, %s709_s7 }
  0xc9   : > { %474 = vrot.lane.b32.xlu2 %v335_v33, %s710_s8  ;;  %401 = vrot.lane.b32.xlu1 %v323_v32, %s709_s7 }
  0xca   : > { %464 = vrot.lane.b32.xlu0 %v320_v28, %s710_s8 }
  0xd1   : > { %417 = vrot.lane.b32.xlu2 %v347_v34, %s709_s7  ;;  %409 = vrot.lane.b32.xlu1 %v335_v33, %s709_s7 }
  0xd2   : > { %425 = vrot.lane.b32.xlu0 %v359_v35, %s709_s7 }
  0xd9   : > { %486 = vrot.lane.b32.xlu2 %v353_v26, %s710_s8  ;;  %466 = vrot.lane.b32.xlu1 %v323_v32, %s710_s8 }
  0xda   : > { %482 = vrot.lane.b32.xlu0 %v347_v34, %s710_s8 }
  0xe1   : > { %490 = vrot.lane.b32.xlu1 %v359_v35, %s710_s8 }
  0xe2   : > { %488 = vrot.lane.b32.xlu0 %v356_v30, %s710_s8 }
  0xeb   : > { %v404_v36 = vpop.permute.xlu2 %403 }
  0xec   : > { %448 = vst.msk [vmem:[%s870_s11 + $0x20] sm:$0xff] %vm443_vm2, %v404_v36 }
  0xf3   : > { %v469_v37 = vpop.permute.xlu2 %468 }
  0xf4   : > { %512 = vst.msk [vmem:[%s878_s14 + $0x20] sm:$0xff] %vm443_vm2, %v469_v37 }
  0xfb   : > { %v412_v38 = vpop.permute.xlu2 %411 }
  0xfc   : > { %452 = vst.msk [vmem:[%s870_s11 + $0x40] sm:$0xff] %vm443_vm2, %v412_v38 }
 0x103   : > { %v406_v39 = vpop.permute.xlu2 %405  ;;  %v461_v40 = vpop.permute.xlu1 %460 }
 0x104   : > { %449 = vst.msk [vmem:[%s870_s11 + $0x28] sm:$0xff] %vm443_vm2, %v406_v39  ;;  %v396_v41 = vpop.permute.xlu0 %395 }
 0x105   : > { %508 = vst.msk [vmem:[%s878_s14] sm:$0xff] %vm443_vm2, %v461_v40 }
 0x106   : > { %444 = vst.msk [vmem:[%s870_s11] sm:$0xff] %vm443_vm2, %v396_v41 }
 0x10b   : > { %v485_v42 = vpop.permute.xlu1 %484  ;;  %v463_v43 = vpop.permute.xlu2 %462 }
 0x10c   : > { %520 = vst.msk [vmem:[%s878_s14 + $0x60] sm:$0xff] %vm443_vm2, %v485_v42  ;;  %v420_v44 = vpop.permute.xlu0 %419 }
 0x10d   : > { %456 = vst.msk [vmem:[%s870_s11 + $0x60] sm:$0xff] %vm443_vm2, %v420_v44 }
 0x10e   : > { %509 = vst.msk [vmem:[%s878_s14 + $0x8] sm:$0xff] %vm443_vm2, %v463_v43 }
 0x113   : > { %v422_v45 = vpop.permute.xlu1 %421  ;;  %v424_v46 = vpop.permute.xlu2 %423 }
 0x114   : > { %457 = vst.msk [vmem:[%s870_s11 + $0x68] sm:$0xff] %vm443_vm2, %v422_v45  ;;  %v477_v47 = vpop.permute.xlu0 %476 }
 0x115   : > { %516 = vst.msk [vmem:[%s878_s14 + $0x40] sm:$0xff] %vm443_vm2, %v477_v47 }
 0x116   : > { %458 = vst.msk [vmem:[%s870_s11 + $0x70] sm:$0xff] %vm443_vm2, %v424_v46 }
 0x11b   : > { %v479_v48 = vpop.permute.xlu1 %478  ;;  %v481_v49 = vpop.permute.xlu2 %480 }
 0x11c   : > { %517 = vst.msk [vmem:[%s878_s14 + $0x48] sm:$0xff] %vm443_vm2, %v479_v48  ;;  %v398_v50 = vpop.permute.xlu0 %397 }
 0x11d   : > { %518 = vst.msk [vmem:[%s878_s14 + $0x50] sm:$0xff] %vm443_vm2, %v481_v49 }
 0x11e   : > { %445 = vst.msk [vmem:[%s870_s11 + $0x8] sm:$0xff] %vm443_vm2, %v398_v50 }
 0x123   : > { %v475_v51 = vpop.permute.xlu2 %474  ;;  %v400_v52 = vpop.permute.xlu1 %399 }
 0x124   : > { %515 = vst.msk [vmem:[%s878_s14 + $0x38] sm:$0xff] %vm443_vm2, %v475_v51  ;;  %v471_v53 = vpop.permute.xlu0 %470 }
 0x125   : > { %513 = vst.msk [vmem:[%s878_s14 + $0x28] sm:$0xff] %vm443_vm2, %v471_v53 }
 0x126   : > { %446 = vst.msk [vmem:[%s870_s11 + $0x10] sm:$0xff] %vm443_vm2, %v400_v52 }
 0x12b   : > { %v418_v54 = vpop.permute.xlu2 %417  ;;  %v473_v55 = vpop.permute.xlu1 %472 }
 0x12c   : > { %455 = vst.msk [vmem:[%s870_s11 + $0x58] sm:$0xff] %vm443_vm2, %v418_v54  ;;  %v414_v56 = vpop.permute.xlu0 %413 }
 0x12d   : > { %453 = vst.msk [vmem:[%s870_s11 + $0x48] sm:$0xff] %vm443_vm2, %v414_v56 }
 0x12e   : > { %514 = vst.msk [vmem:[%s878_s14 + $0x30] sm:$0xff] %vm443_vm2, %v473_v55 }
 0x133   : > { %v487_v57 = vpop.permute.xlu2 %486  ;;  %v416_v58 = vpop.permute.xlu1 %415 }
 0x134   : > { %521 = vst.msk [vmem:[%s878_s14 + $0x68] sm:$0xff] %vm443_vm2, %v487_v57  ;;  %v408_v59 = vpop.permute.xlu0 %407 }
 0x135   : > { %450 = vst.msk [vmem:[%s870_s11 + $0x30] sm:$0xff] %vm443_vm2, %v408_v59 }
 0x136   : > { %454 = vst.msk [vmem:[%s870_s11 + $0x50] sm:$0xff] %vm443_vm2, %v416_v58 }
 0x13b   : > { %v402_v60 = vpop.permute.xlu1 %401 }
 0x13c   : > { %v465_v61 = vpop.permute.xlu0 %464  ;;  %447 = vst.msk [vmem:[%s870_s11 + $0x18] sm:$0xff] %vm443_vm2, %v402_v60 }
 0x13d   : > { %510 = vst.msk [vmem:[%s878_s14 + $0x10] sm:$0xff] %vm443_vm2, %v465_v61 }
 0x143   : > { %v410_v62 = vpop.permute.xlu1 %409 }
 0x144   : > { %v426_v63 = vpop.permute.xlu0 %425  ;;  %451 = vst.msk [vmem:[%s870_s11 + $0x38] sm:$0xff] %vm443_vm2, %v410_v62 }
 0x145   : > { %459 = vst.msk [vmem:[%s870_s11 + $0x78] sm:$0xff] %vm443_vm2, %v426_v63 }
 0x14b   : > { %v467_v0 = vpop.permute.xlu1 %466 }
 0x14c   : > { %v483_v1 = vpop.permute.xlu0 %482  ;;  %511 = vst.msk [vmem:[%s878_s14 + $0x18] sm:$0xff] %vm443_vm2, %v467_v0 }
 0x14d   : > { %519 = vst.msk [vmem:[%s878_s14 + $0x58] sm:$0xff] %vm443_vm2, %v483_v1 }
 0x153   : > { %v491_v2 = vpop.permute.xlu1 %490 }
 0x154   : > { %v489_v3 = vpop.permute.xlu0 %488  ;;  %523 = vst.msk [vmem:[%s878_s14 + $0x78] sm:$0xff] %vm443_vm2, %v491_v2 }
 0x155   : > { %522 = vst.msk [vmem:[%s878_s14 + $0x70] sm:$0xff] %vm443_vm2, %v489_v3 }
 0x156 PF: > { %s15_s15 = sadd.s32 1, %s707_s15  }
 0x157   : > { %p12_p4 = scmp.ge.s32.totalorder %s15_s15, 4  }
 0x159   :  { %14 = sbr.rel (!%p12_p4) target bundleno = 1 (0x1), region = 82 }

</bundles_post_ra>
